<compile_context>
chip_gen: v7x
topology: tpu7x:2x2x1
jax: 0.10.0
libtpu: 0.0.40
codegen_flags: <defaults>
</compile_context>

<pallas_src>
import functools

import jax
import jax.numpy as jnp
from jax.experimental import pallas as pl
from jax.experimental.pallas import tpu as pltpu


def _round_up(x, m):
    return (x + m - 1) // m * m


def _conv_gate_kernel(x_ref, w_ref, b_ref, out2_ref, cw_ref, acc_ref, *,
                      n_ch, hw_valid, hw_tile, hw_total, use_bf16):
    """Fused conv1+conv2 (1x1), relu(out2) write, sigmoid spatial-sum accum.

    Block shapes:
      x_ref    (1, C, hw_tile)   input tile: channels on sublanes, HW on lanes
      w_ref    (2C, C)           [w1; w2] stacked along output channels
      b_ref    (2C, 1)           [b1; b2]
      out2_ref (1, C, hw_tile)   relu(conv2(x)) tile (lane-dense store)
      cw_ref   (1, C, 1)         channel-wise gate, written on last HW tile
      acc_ref  (C, 1) f32        running sum of sigmoid(conv1(x)) over HW
    """
    t = pl.program_id(1)

    @pl.when(t == 0)
    def _():
        acc_ref[...] = jnp.zeros_like(acc_ref)

    x = x_ref[0]          # (C, hw_tile) f32
    w = w_ref[...]        # (2C, C)      f32
    b = b_ref[...]        # (2C, 1)      f32

    if use_bf16:
        xm = x.astype(jnp.bfloat16)
        wm = w.astype(jnp.bfloat16)
    else:
        xm, wm = x, w

    # Single MXU pass for both 1x1 convs; f32 accumulation, bias add in f32.
    y = jnp.dot(wm, xm, preferred_element_type=jnp.float32) + b  # (2C, hw_tile)
    y1 = y[:n_ch]          # conv1 pre-activation
    y2 = y[n_ch:]          # conv2 pre-activation

    # conv1 -> sigmoid -> spatial sum (lane reduce -> XLU slot, co-issues).
    s1 = jax.nn.sigmoid(y1)
    if hw_valid != hw_total:
        # Mask padded spatial positions so they don't pollute the mean.
        col = jax.lax.broadcasted_iota(jnp.int32, (1, hw_tile), 1) + t * hw_tile
        s1 = jnp.where(col < hw_valid, s1, 0.0)
    acc_ref[...] += jnp.sum(s1, axis=1, keepdims=True)           # (C, 1)

    # conv2 -> relu, streamed out tile-by-tile.
    out2_ref[...] = jnp.maximum(y2, 0.0)[None].astype(out2_ref.dtype)

    @pl.when(t == pl.num_programs(1) - 1)
    def _():
        cw_ref[...] = (acc_ref[...] * (1.0 / hw_valid))[None].astype(cw_ref.dtype)


def _rescale_kernel(out2_ref, cw_ref, out_ref):
    """out = out2 * cw  (channel gate broadcast over the HW lane axis)."""
    out_ref[...] = (out2_ref[...] * cw_ref[...]).astype(out_ref.dtype)


@functools.partial(jax.jit, static_argnames=("use_bf16_matmul", "hw_tile_target"))
def senet_block(x, w1, b1, w2, b2, *, use_bf16_matmul=True, hw_tile_target=1024):
    """x: (B, C, H, W) float32 (NCHW). w1, w2: (C, C) 1x1-conv weights
    (PyTorch weight squeezed over the 1x1 spatial dims). b1, b2: (C,) biases.
    Returns (out, cw, out2) matching the PyTorch module."""
    B, C, H, W = x.shape
    HW = H * W

    # NCHW -> (B, C, HW): pure reshape (HW is already the contiguous minor
    # axis in NCHW), so no transpose and no extra HBM traffic.
    x_flat = x.reshape(B, C, HW)

    # HW tiling: lane axis must be a multiple of 128; cap the tile so the
    # VMEM working set stays small on every generation (re-derive the cap for
    # very large C or for v7x's 64 MiB VMEM if needed).
    hw_tile = min(_round_up(HW, 128), _round_up(hw_tile_target, 128))
    hw_pad = _round_up(HW, hw_tile)
    if hw_pad != HW:
        x_flat = jnp.pad(x_flat, ((0, 0), (0, 0), (0, hw_pad - HW)))
    num_tiles = hw_pad // hw_tile

    # Fuse the two 1x1 convs: one (2C, C) weight, one (2C, 1) bias.
    w_fused = jnp.concatenate([w1, w2], axis=0)
    b_fused = jnp.concatenate([b1, b2], axis=0).reshape(2 * C, 1)

    kernel = functools.partial(
        _conv_gate_kernel, n_ch=C, hw_valid=HW, hw_tile=hw_tile,
        hw_total=hw_pad, use_bf16=use_bf16_matmul)

    # Pass 1: fused convs + relu(out2) + channel-gate accumulation.
    # NOTE: for v7x (2 TCs) with B == 1 the "parallel" batch axis is thin;
    # work still pipelines over the HW tiles within one core.
    out2_pad, cw = pl.pallas_call(
        kernel,
        out_shape=(
            jax.ShapeDtypeStruct((B, C, hw_pad), x.dtype),   # out2
            jax.ShapeDtypeStruct((B, C, 1), x.dtype),        # channel gate
        ),
        grid=(B, num_tiles),
        in_specs=[
            pl.BlockSpec((1, C, hw_tile), lambda b, t: (b, 0, t)),   # x
            pl.BlockSpec((2 * C, C), lambda b, t: (0, 0)),           # fused W
            pl.BlockSpec((2 * C, 1), lambda b, t: (0, 0)),           # fused b
        ],
        out_specs=(
            pl.BlockSpec((1, C, hw_tile), lambda b, t: (b, 0, t)),   # out2
            pl.BlockSpec((1, C, 1), lambda b, t: (b, 0, 0)),         # cw
        ),
        scratch_shapes=[pltpu.VMEM((C, 1), jnp.float32)],
        compiler_params=pltpu.CompilerParams(
            dimension_semantics=("parallel", "arbitrary"),
            vmem_limit_bytes=32 * 1024 * 1024),
    )(x_flat, w_fused, b_fused)

    # Pass 2: cheap elementwise rescale by the (now complete) channel gate.
    out_pad = pl.pallas_call(
        _rescale_kernel,
        out_shape=jax.ShapeDtypeStruct((B, C, hw_pad), x.dtype),
        grid=(B, num_tiles),
        in_specs=[
            pl.BlockSpec((1, C, hw_tile), lambda b, t: (b, 0, t)),   # out2
            pl.BlockSpec((1, C, 1), lambda b, t: (b, 0, 0)),         # cw
        ],
        out_specs=pl.BlockSpec((1, C, hw_tile), lambda b, t: (b, 0, t)),
        compiler_params=pltpu.CompilerParams(
            dimension_semantics=("parallel", "parallel"),
            vmem_limit_bytes=32 * 1024 * 1024),
    )(out2_pad, cw)

    # Crop padding (no-op when HW is a multiple of hw_tile) and view back as
    # NCHW -- reshape only, still no transpose.
    out2 = out2_pad[:, :, :HW].reshape(B, C, H, W)
    out = out_pad[:, :, :HW].reshape(B, C, H, W)
    cw = cw.reshape(B, C)
    return out, cw, out2


def _reference(x, w1, b1, w2, b2):
    """Pure-JAX reference mirroring the PyTorch forward (sanity check)."""
    y1 = jnp.einsum('bchw,oc->bohw', x, w1) + b1[None, :, None, None]
    s1 = jax.nn.sigmoid(y1)
    cw = jnp.mean(s1.reshape(s1.shape[0], s1.shape[1], -1), axis=2)
    y2 = jnp.einsum('bchw,oc->bohw', x, w2) + b2[None, :, None, None]
    r2 = jnp.maximum(y2, 0.0)
    out = r2 * cw[:, :, None, None]
    return out, cw, r2


if __name__ == "__main__":
    key = jax.random.PRNGKey(0)
    B, C, H, W = 2, 4, 16, 16

    kx, kw1, kb1, kw2, kb2 = jax.random.split(key, 5)
    x = jax.random.normal(kx, (B, C, H, W), dtype=jnp.float32)

    # Deterministic parameter init (shapes from nn.Conv2d(C, C, 1)).
    bound = 1.0 / (C ** 0.5)
    w1 = jax.random.uniform(kw1, (C, C), jnp.float32, -bound, bound)
    b1 = jax.random.uniform(kb1, (C,), jnp.float32, -bound, bound)
    w2 = jax.random.uniform(kw2, (C, C), jnp.float32, -bound, bound)
    b2 = jax.random.uniform(kb2, (C,), jnp.float32, -bound, bound)
    # TODO(synk): conv_classify parameters exist in the module but are unused
    # in forward, so they are intentionally not modeled.

    out_r, cw_r, out2_r = _reference(x, w1, b1, w2, b2)

    # Exact path (f32 MXU inputs): bit-tight against the f32 reference.
    out, cw, out2 = senet_block(x, w1, b1, w2, b2, use_bf16_matmul=False)
    jax.block_until_ready((out, cw, out2))
    assert out.shape == (B, C, H, W) and cw.shape == (B, C) and out2.shape == (B, C, H, W)
    assert jnp.allclose(out, out_r, atol=1e-5, rtol=1e-5)
    assert jnp.allclose(cw, cw_r, atol=1e-5, rtol=1e-5)
    assert jnp.allclose(out2, out2_r, atol=1e-5, rtol=1e-5)

    # Default fast path (bf16 MXU inputs, f32 accumulation / elementwise).
    out_b, cw_b, out2_b = senet_block(x, w1, b1, w2, b2)
    jax.block_until_ready((out_b, cw_b, out2_b))
    assert jnp.allclose(out_b, out_r, atol=2e-2, rtol=2e-2)
    assert jnp.allclose(cw_b, cw_r, atol=2e-2, rtol=2e-2)
    assert jnp.allclose(out2_b, out2_r, atol=2e-2, rtol=2e-2)

    print("KERNEL_OK")
</pallas_src>

<mosaic_0001>
module attributes {stable_mosaic.version = 11 : i64} {
  func.func @_rescale_kernel(%arg0: i32, %arg1: i32, %arg2: memref<1x4x256xf32, #tpu.memory_space<vmem>>, %arg3: memref<1x4x1xf32, #tpu.memory_space<vmem>>, %arg4: memref<1x4x256xf32, #tpu.memory_space<vmem>>) attributes {dimension_semantics = [#tpu.dimension_semantics<parallel>, #tpu.dimension_semantics<parallel>], iteration_bounds = array<i64: 2, 1>, scalar_prefetch = 0 : i64, scratch_operands = 0 : i64, tpu.core_type = #tpu.core_type<tc>, window_params = [{transform_indices = @transform_0, window_bounds = array<i64: 1, 4, 256>}, {transform_indices = @transform_1, window_bounds = array<i64: 1, 4, 1>}, {transform_indices = @transform_2, window_bounds = array<i64: 1, 4, 256>}]} {
    %c0 = arith.constant 0 : index
    %c0_0 = arith.constant 0 : index
    %c0_1 = arith.constant 0 : index
    %0 = vector.load %arg2[%c0, %c0_0, %c0_1] : memref<1x4x256xf32, #tpu.memory_space<vmem>>, vector<1x4x256xf32>
    %c0_2 = arith.constant 0 : index
    %c0_3 = arith.constant 0 : index
    %c0_4 = arith.constant 0 : index
    %1 = vector.load %arg3[%c0_2, %c0_3, %c0_4] : memref<1x4x1xf32, #tpu.memory_space<vmem>>, vector<1x4x1xf32>
    %2 = vector.broadcast %1 : vector<1x4x1xf32> to vector<1x4x256xf32>
    %3 = arith.mulf %0, %2 : vector<1x4x256xf32>
    %c0_5 = arith.constant 0 : index
    %c0_6 = arith.constant 0 : index
    %c0_7 = arith.constant 0 : index
    %4 = vector.load %arg4[%c0_5, %c0_6, %c0_7] : memref<1x4x256xf32, #tpu.memory_space<vmem>>, vector<1x4x256xf32>
    tpu.vector_store %arg4[%c0_5, %c0_6, %c0_7], %3 {strides = array<i32>} : memref<1x4x256xf32, #tpu.memory_space<vmem>>, vector<1x4x256xf32>,
    return
  }
  func.func @transform_0(%arg0: i32, %arg1: i32) -> (i32, i32, i32) {
    %c0_i32 = arith.constant 0 : i32
    %c0_i32_0 = arith.constant 0 : i32
    return %arg0, %c0_i32, %arg1 : i32, i32, i32
  }
  func.func @transform_1(%arg0: i32, %arg1: i32) -> (i32, i32, i32) {
    %c0_i32 = arith.constant 0 : i32
    %c0_i32_0 = arith.constant 0 : i32
    %c0_i32_1 = arith.constant 0 : i32
    return %arg0, %c0_i32, %c0_i32_0 : i32, i32, i32
  }
  func.func @transform_2(%arg0: i32, %arg1: i32) -> (i32, i32, i32) {
    %c0_i32 = arith.constant 0 : i32
    %c0_i32_0 = arith.constant 0 : i32
    return %arg0, %c0_i32, %arg1 : i32, i32, i32
  }
}

module attributes {stable_mosaic.version = 11 : i64} {
  func.func @_conv_gate_kernel(%arg0: i32, %arg1: i32, %arg2: memref<1x4x256xf32, #tpu.memory_space<vmem>>, %arg3: memref<8x4xf32, #tpu.memory_space<vmem>>, %arg4: memref<8x1xf32, #tpu.memory_space<vmem>>, %arg5: memref<1x4x256xf32, #tpu.memory_space<vmem>>, %arg6: memref<1x4x1xf32, #tpu.memory_space<vmem>>, %arg7: memref<4x1xf32, #tpu.memory_space<vmem>>) attributes {dimension_semantics = [#tpu.dimension_semantics<parallel>, #tpu.dimension_semantics<arbitrary>], iteration_bounds = array<i64: 2, 1>, scalar_prefetch = 0 : i64, scratch_operands = 1 : i64, tpu.core_type = #tpu.core_type<tc>, window_params = [{transform_indices = @transform_0, window_bounds = array<i64: 1, 4, 256>}, {pipeline_mode = #tpu.pipeline_mode<synchronous>, transform_indices = @transform_1, window_bounds = array<i64: 8, 4>}, {pipeline_mode = #tpu.pipeline_mode<synchronous>, transform_indices = @transform_2, window_bounds = array<i64: 8, 1>}, {transform_indices = @transform_3, window_bounds = array<i64: 1, 4, 256>}, {transform_indices = @transform_4, window_bounds = array<i64: 1, 4, 1>}]} {
    %c0_i32 = arith.constant 0 : i32
    %0 = arith.cmpi eq, %arg1, %c0_i32 : i32
    %1 = arith.extui %0 : i1 to i32
    %c0_i32_0 = arith.constant 0 : i32
    %2 = arith.cmpi ne, %1, %c0_i32_0 : i32
    scf.if %2 {
      %cst_19 = arith.constant 0.000000e+00 : f32
      %29 = vector.broadcast %cst_19 : f32 to vector<4x1xf32>
      %c0_20 = arith.constant 0 : index
      %c0_21 = arith.constant 0 : index
      %30 = vector.load %arg7[%c0_20, %c0_21] : memref<4x1xf32, #tpu.memory_space<vmem>>, vector<4x1xf32>
      tpu.vector_store %arg7[%c0_20, %c0_21], %29 {strides = array<i32>} : memref<4x1xf32, #tpu.memory_space<vmem>>, vector<4x1xf32>,
    } else {
    }
    %c0 = arith.constant 0 : index
    %c0_1 = arith.constant 0 : index
    %c0_2 = arith.constant 0 : index
    %3 = vector.load %arg2[%c0, %c0_1, %c0_2] : memref<1x4x256xf32, #tpu.memory_space<vmem>>, vector<1x4x256xf32>
    %4 = vector.shape_cast %3 : vector<1x4x256xf32> to vector<4x256xf32>
    %c0_3 = arith.constant 0 : index
    %c0_4 = arith.constant 0 : index
    %5 = vector.load %arg3[%c0_3, %c0_4] : memref<8x4xf32, #tpu.memory_space<vmem>>, vector<8x4xf32>
    %c0_5 = arith.constant 0 : index
    %c0_6 = arith.constant 0 : index
    %6 = vector.load %arg4[%c0_5, %c0_6] : memref<8x1xf32, #tpu.memory_space<vmem>>, vector<8x1xf32>
    %cst = arith.constant dense<0.000000e+00> : vector<8x256xf32>
    %7 = tpu.matmul %5, %4, %cst {dimension_numbers = #tpu.dot_dimension_numbers<[1], [0], [0], [1], [0, 0, 1, 1], [], []>} : vector<8x4xf32>, vector<4x256xf32>, vector<8x256xf32> -> vector<8x256xf32>
    %8 = vector.broadcast %6 : vector<8x1xf32> to vector<8x256xf32>
    %9 = arith.addf %7, %8 : vector<8x256xf32>
    %10 = vector.extract_strided_slice %9 {offsets = [0, 0], sizes = [4, 256], strides = [1, 1]} : vector<8x256xf32> to vector<4x256xf32>
    %11 = vector.extract_strided_slice %9 {offsets = [4, 0], sizes = [4, 256], strides = [1, 1]} : vector<8x256xf32> to vector<4x256xf32>
    %12 = arith.negf %10 : vector<4x256xf32>
    %13 = math.exp %12 : vector<4x256xf32>
    %cst_7 = arith.constant 1.000000e+00 : f32
    %14 = vector.broadcast %cst_7 : f32 to vector<4x256xf32>
    %15 = arith.addf %14, %13 : vector<4x256xf32>
    %16 = arith.divf %14, %15 : vector<4x256xf32>
    %c0_8 = arith.constant 0 : index
    %c0_9 = arith.constant 0 : index
    %17 = vector.load %arg7[%c0_8, %c0_9] : memref<4x1xf32, #tpu.memory_space<vmem>>, vector<4x1xf32>
    %cst_10 = arith.constant dense<0.000000e+00> : vector<4xf32>
    %18 = vector.multi_reduction <add>, %16, %cst_10 [1] : vector<4x256xf32> to vector<4xf32>
    %19 = vector.shape_cast %18 : vector<4xf32> to vector<4x1xf32>
    %20 = arith.addf %17, %19 : vector<4x1xf32>
    %c0_11 = arith.constant 0 : index
    %c0_12 = arith.constant 0 : index
    %21 = vector.load %arg7[%c0_11, %c0_12] : memref<4x1xf32, #tpu.memory_space<vmem>>, vector<4x1xf32>
    tpu.vector_store %arg7[%c0_11, %c0_12], %20 {strides = array<i32>} : memref<4x1xf32, #tpu.memory_space<vmem>>, vector<4x1xf32>,
    %cst_13 = arith.constant 0.000000e+00 : f32
    %22 = vector.broadcast %cst_13 : f32 to vector<4x256xf32>
    %23 = arith.maximumf %11, %22 : vector<4x256xf32>
    %24 = vector.shape_cast %23 : vector<4x256xf32> to vector<1x4x256xf32>
    %c0_14 = arith.constant 0 : index
    %c0_15 = arith.constant 0 : index
    %c0_16 = arith.constant 0 : index
    %25 = vector.load %arg5[%c0_14, %c0_15, %c0_16] : memref<1x4x256xf32, #tpu.memory_space<vmem>>, vector<1x4x256xf32>
    tpu.vector_store %arg5[%c0_14, %c0_15, %c0_16], %24 {strides = array<i32>} : memref<1x4x256xf32, #tpu.memory_space<vmem>>, vector<1x4x256xf32>,
    %c0_i32_17 = arith.constant 0 : i32
    %26 = arith.cmpi eq, %arg1, %c0_i32_17 : i32
    %27 = arith.extui %26 : i1 to i32
    %c0_i32_18 = arith.constant 0 : i32
    %28 = arith.cmpi ne, %27, %c0_i32_18 : i32
    scf.if %28 {
      %c0_19 = arith.constant 0 : index
      %c0_20 = arith.constant 0 : index
      %29 = vector.load %arg7[%c0_19, %c0_20] : memref<4x1xf32, #tpu.memory_space<vmem>>, vector<4x1xf32>
      %cst_21 = arith.constant 3.906250e-03 : f32
      %30 = vector.broadcast %cst_21 : f32 to vector<4x1xf32>
      %31 = arith.mulf %29, %30 : vector<4x1xf32>
      %32 = vector.shape_cast %31 : vector<4x1xf32> to vector<1x4x1xf32>
      %c0_22 = arith.constant 0 : index
      %c0_23 = arith.constant 0 : index
      %c0_24 = arith.constant 0 : index
      %33 = vector.load %arg6[%c0_22, %c0_23, %c0_24] : memref<1x4x1xf32, #tpu.memory_space<vmem>>, vector<1x4x1xf32>
      tpu.vector_store %arg6[%c0_22, %c0_23, %c0_24], %32 {strides = array<i32>} : memref<1x4x1xf32, #tpu.memory_space<vmem>>, vector<1x4x1xf32>,
    } else {
    }
    return
  }
  func.func @transform_0(%arg0: i32, %arg1: i32) -> (i32, i32, i32) {
    %c0_i32 = arith.constant 0 : i32
    %c0_i32_0 = arith.constant 0 : i32
    return %arg0, %c0_i32, %arg1 : i32, i32, i32
  }
  func.func @transform_1(%arg0: i32, %arg1: i32) -> (i32, i32) {
    %c0_i32 = arith.constant 0 : i32
    %c0_i32_0 = arith.constant 0 : i32
    %c0_i32_1 = arith.constant 0 : i32
    return %c0_i32, %c0_i32_0 : i32, i32
  }
  func.func @transform_2(%arg0: i32, %arg1: i32) -> (i32, i32) {
    %c0_i32 = arith.constant 0 : i32
    %c0_i32_0 = arith.constant 0 : i32
    %c0_i32_1 = arith.constant 0 : i32
    return %c0_i32, %c0_i32_0 : i32, i32
  }
  func.func @transform_3(%arg0: i32, %arg1: i32) -> (i32, i32, i32) {
    %c0_i32 = arith.constant 0 : i32
    %c0_i32_0 = arith.constant 0 : i32
    return %arg0, %c0_i32, %arg1 : i32, i32, i32
  }
  func.func @transform_4(%arg0: i32, %arg1: i32) -> (i32, i32, i32) {
    %c0_i32 = arith.constant 0 : i32
    %c0_i32_0 = arith.constant 0 : i32
    %c0_i32_1 = arith.constant 0 : i32
    return %arg0, %c0_i32, %c0_i32_0 : i32, i32, i32
  }
}

</mosaic_0001>

<bundles_post_ra>
// kernel: senet_block.3
= control target key start
LH: loop header
LB: loop body
LE: loop exit
PB: predicated region body
PF: predicated region fallthrough
CT: control target
= control target key end

     0   :  { %s397_s9 = smov 0   ;;  %s399_s10 = smov 0   ;;  %s430_s0 = inlined_call_operand.vmem [shape: f32[2,4,256], index: 0, kind: input, shape index: {}]   ;;  %s431_s1 = inlined_call_operand.vmem [shape: f32[2,4,1], index: 1, kind: input, shape index: {}]   ;;  %s432_s2 = inlined_call_operand.vmem [shape: f32[2,4,256], index: 2, kind: output, shape index: {}]  }
   0x1   :  { %s401_s11 = smov 0  }
   0x2 LB: > { %s24_s12 = sadd.s32 1, %s374_s10  ;;  %p319_p0 = scmp.ge.s32.totalorder %s378_s11, 1  ;;  %s378_s11 = sphi %s401_s11, %s12_s11   ;;  %s374_s10 = sphi %s399_s10, %s434_s10   ;;  %s370_s9 = sphi %s397_s9, %s433_s9  }
   0x3   : > { %p26_p1 = scmp.ge.s32.totalorder %s24_s12, 2  ;;  %p142_p2 = scmp.lt.s32.totalorder %s378_s11, 3 }
   0x5   : > { %s436_s12 = smov (%p26_p1, %s24_s12), 0  ;;  %p143_p3 = pnand %p319_p0, %p142_p2 }
   0x6   : > { %p177_p4 = scmp.lt.s32.totalorder (!%p143_p3), %s370_s9, 1  ;;  %v380_v0 = vmov (!%p143_p3), 0   ;;  %v381_v2 = vmov (!%p143_p3), 839922192   ;;  %v209_v4 = vlaneseq (!%p143_p3) }
   0x7   : > { %146 = sbr.rel (%p143_p3) target bundleno = 151 (0x97), region = 28  ;;  %355 = vset.pattern.permute.xlu0 (!%p143_p3), %v380_v0  ;;  %v207_v3 = vunpack.c.l.s4 (!%p143_p3), %v381_v2 }
   0x8   : > { %v210_v6 = vshrl.u32 (!%p143_p3), %v209_v4, 7 }
   0x9   : > { %v208_v5 = vunpack.c.0.s8 (!%p143_p3), %v207_v3 }
   0xb   : > { %v211_v7 = vsub.s32 (!%p143_p3), %v208_v5, %v210_v6 }
   0xe   : > { %s438_s9 = smov (!%p177_p4, %s370_s9), 1 }
   0xf   : > { %s322_s13 = sshll.u32 %s438_s9, 2  ;;  %s327_s17 = sshll.u32 %s438_s9, 3 }
  0x10   : > { %s189_s16 = scalar_lea.vmem %s431_s1, %s322_s13  ;;  %s184_s20 = scalar_lea.vmem %s430_s0, %s327_s17 }
  0x11   : > { %v201_v1 = vld [vmem:[%s189_s16] sm:$0xf]  ;;  %s198_s23 = scalar_lea.vmem %s432_s2, %s327_s17 }
  0x12   : > { %204 = vperm.xlu0 %355, %v201_v1   ;;  %v200_v9 = vld [vmem:[%s184_s20] sm:$0xff] }
  0x91   : > { %v205_v8 = vpop.permute.xlu0 %204 }
  0x92   : > { %v212_v10 = vrot.slane %v205_v8, %v211_v7 }
  0x94   : > { %v214_v11 = vmul.f32 %v212_v10, %v200_v9 }
  0x96   : > { %215 = vst [vmem:[%s198_s23] sm:$0xff] %v214_v11 }
  0x97 PF: > { %s12_s11 = sadd.s32 1, %s378_s11   ;;  %s433_s9 = smov %s374_s10 }
  0x98   : > { %p9_p5 = scmp.ge.s32.totalorder %s12_s11, 4   ;;  %s434_s10 = smov %s436_s12 }
  0x9a   :  { %11 = sbr.rel (!%p9_p5) target bundleno = 2 (0x2), region = 61 }

// kernel: senet_block.2
= control target key start
LH: loop header
LB: loop body
LE: loop exit
PB: predicated region body
PF: predicated region fallthrough
CT: control target
= control target key end

     0   :  { %s602_s15 = smov 0   ;;  %s604_s16 = smov 0   ;;  %s655_s0 = inlined_call_operand.vmem [shape: f32[2,4,256], index: 0, kind: input, shape index: {}]   ;;  %s656_s1 = inlined_call_operand.vmem [shape: f32[8,4], index: 1, kind: input, shape index: {}]   ;;  %s657_s2 = inlined_call_operand.vmem [shape: f32[8,1], index: 2, kind: input, shape index: {}]   ;;  %s658_s3 = inlined_call_operand.vmem [shape: f32[2,4,256], index: 3, kind: output, shape index: {0}]   ;;  %s659_s4 = inlined_call_operand.vmem [shape: f32[2,4,1], index: 4, kind: output, shape index: {1}]  }
   0x1   :  { %s606_s17 = smov 0  }
   0x2 LB: > { %s27_s18 = sadd.s32 1, %s569_s16  ;;  %p500_p0 = scmp.ge.s32.totalorder %s573_s17, 1  ;;  %s573_s17 = sphi %s606_s17, %s15_s17   ;;  %s569_s16 = sphi %s604_s16, %s661_s16   ;;  %s565_s15 = sphi %s602_s15, %s660_s15  }
   0x3   : > { %p29_p1 = scmp.ge.s32.totalorder %s27_s18, 2  ;;  %p186_p2 = scmp.lt.s32.totalorder %s573_s17, 3 }
   0x5   : > { %s663_s18 = smov (%p29_p1, %s27_s18), 0  ;;  %p187_p3 = pnand %p500_p0, %p186_p2 }
   0x6   : > { %p225_p4 = scmp.lt.s32.totalorder (!%p187_p3), %s565_s15, 1  ;;  %vm252_vm0 = vcmask (!%p187_p3), 3072   ;;  %v575_v0 = vmov (!%p187_p3), 0.0   ;;  %v256_v1 = vld [vmem:[%s657_s2] sm:$0xff] (!%p187_p3)  ;;  %v576_v2 = vmov (!%p187_p3), 0   ;;  %vm268_vm1 = vcmask (!%p187_p3), 1043456  }
   0x7   : > { %190 = sbr.rel (%p187_p3) target bundleno = 421 (0x1a5), region = 32  ;;  %253 = vst.msk [vmem:[#allocation2] sm:$0xf] (!%p187_p3), %vm252_vm0, %v575_v0  ;;  %337 = vmatprep.mubr.f32.mxu0 (!%p187_p3), %v575_v0  ;;  %541 = vset.pattern.permute.xlu0 (!%p187_p3), %v576_v2  ;;  %v255_v5 = vld [vmem:[%s656_s1] sm:$0xff] (!%p187_p3)  ;;  %vm264_vm2 = vcmask (!%p187_p3), 31744  }
   0x8   : > { %259 = vperm.xlu0 (!%p187_p3), %541, %v256_v1  }
   0xe   : > { %s665_s15 = smov (!%p225_p4, %s565_s15), 1  ;;  %v356_v25 = vld [vmem:[#allocation2] sm:$0xf] }
   0xf   : > { %s513_s21 = sshll.u32 %s665_s15, 3  ;;  %s505_s30 = sshll.u32 %s665_s15, 2 }
  0x10   : > { %s232_s24 = scalar_lea.vmem %s655_s0, %s513_s21  ;;  %s242_s29 = scalar_lea.vmem %s658_s3, %s513_s21 }
  0x11   : > { %v254_v3 = vld [vmem:[%s232_s24] sm:$0xff]  ;;  %s247_s7 = scalar_lea.vmem %s659_s4, %s505_s30 }
  0x12   : > { %v263_v4 = vcombine.high %v254_v3, %v254_v3 }
  0x14   : > { %506 = vmatprep.subr.msk.mxu0 %vm268_vm1, %v263_v4 }
  0x15   : > { %507 = vmatpush1.msk.msra.mxu0 %vm268_vm1, %v254_v3 }
  0x16   : > { %508 = vmatmul.mubr.msk.f32.vlgmr.msra.gmra.mrb[0].mxu0 %vm264_vm2, %v255_v5 }
  0x87   : > { %v260_v6 = vpop.permute.xlu0 %259 }
  0xe9   : > { %v339_v7 = vpop.f32.mrb[0].mxu0 }
  0xea   : > { %v340_v8 = vadd.f32 %v339_v7, %v260_v6  ;;  %v341_v9 = vpop.f32.mrb[1].mxu0 }
  0xeb   : > { %v342_v10 = vadd.f32 %v341_v9, %v260_v6 }
  0xec   : > { %v509_v11 = vmul.f32 -1.442695, %v340_v8  ;;  %v365_v12 = vmax.f32 %v340_v8, 0.0 }
  0xed   : > { %v510_v13 = vmul.f32 -1.442695, %v342_v10  ;;  %v366_v14 = vmax.f32 %v342_v10, 0.0 }
  0xee   : > { %543 = vpow2.f32 %v509_v11 }
  0xef   : > { %545 = vpow2.f32 %v510_v13  ;;  %v369_v15 = vcombine.high %v365_v12, %v366_v14 }
  0xf1   : > { %371 = vst [vmem:[%s242_s29] sm:$0xff] %v369_v15 }
  0xf8   : > { %v544_v16 = vpop.eup %543 }
  0xf9   : > { %v546_v17 = vpop.eup %545  ;;  %v350_v18 = vadd.f32 1.0, %v544_v16 }
  0xfa   : > { %v351_v19 = vadd.f32 1.0, %v546_v17 }
  0xfb   : > { %547 = vrcp.f32 %v350_v18 }
  0xfc   : > { %549 = vrcp.f32 %v351_v19 }
 0x105   : > { %v548_v20 = vpop.eup %547 }
 0x106   : > { %v550_v21 = vpop.eup %549  ;;  %v357_v22 = vsel %vm268_vm1, %v548_v20, 0.0 }
 0x107   : > { %v358_v23 = vsel %vm268_vm1, %v550_v21, 0.0 }
 0x108   : > { %v359_v24 = vadd.f32 %v358_v23, %v357_v22 }
 0x10a   : > { %360 = vadd.xlane.f32.xlu0 %v359_v24 }
 0x197   : > { %v361_v26 = vpop.xlane.xlu0 %360 }
 0x198   : > { %v362_v27 = vadd.f32 %v361_v26, %v356_v25 }
 0x19a   : > { %364 = vst.msk [vmem:[#allocation2] sm:$0xf] %vm252_vm0, %v362_v27 }
 0x1a1   : > { %v375_v28 = vld [vmem:[#allocation2] sm:$0xf] }
 0x1a2   : > { %v376_v29 = vmul.f32 0.00390625, %v375_v28 }
 0x1a4   : > { %377 = vst.msk [vmem:[%s247_s7] sm:$0xf] %vm252_vm0, %v376_v29 }
 0x1a5 PF: > { %s15_s17 = sadd.s32 1, %s573_s17   ;;  %s660_s15 = smov %s569_s16 }
 0x1a6   : > { %p12_p5 = scmp.ge.s32.totalorder %s15_s17, 4   ;;  %s661_s16 = smov %s663_s18 }
 0x1a8   :  { %14 = sbr.rel (!%p12_p5) target bundleno = 2 (0x2), region = 82 }

</bundles_post_ra>
